<compile_context>
chip_gen: v6e
topology: v6e:2x2x1
jax: 0.10.0
libtpu: 0.0.40
codegen_flags: <defaults>
</compile_context>

<pallas_src>
import jax
import jax.numpy as jnp
from jax import lax
from jax.experimental import pallas as pl
from jax.experimental.pallas import tpu as pltpu


def _round_up(x: int, m: int) -> int:
    return ((x + m - 1) // m) * m


def _tpu_vmem_bytes() -> int:
    """Physical VMEM per TensorCore (falls back to the smallest, v7x = 64 MiB)."""
    try:
        return int(pltpu.get_tpu_info().vmem_capacity_bytes)
    except Exception:
        return 64 * 1024 * 1024


def _num_tensorcores() -> int:
    """Best-effort TensorCores-per-chip query (v7x = 2, v5e/v6e = 1)."""
    try:
        info = pltpu.get_tpu_info()
        for attr in ("num_cores", "tensorcores_per_chip", "num_tensorcores",
                     "cores_per_chip"):
            v = getattr(info, attr, None)
            if isinstance(v, int) and v > 0:
                return v
    except Exception:
        pass
    return 1


def _vmem_budget_bytes(phys: int) -> int:
    """Per-step data footprint budget, *including* compiler-materialized temporaries."""
    # v5e/v6e (128 MiB physical) -> 24 MiB; v7x (64 MiB per TC) -> ~21 MiB.
    return int(max(min(phys // 3, 24 * 1024 * 1024), 8 * 1024 * 1024))


def _compiler_params(dim_sem, budget: int, phys: int) -> pltpu.CompilerParams:
    # Raise the scoped-VMEM limit above the footprint (covers the exp temporary and
    # double-buffering) but stay well below physical VMEM.
    vmem_limit = int(min(max(2 * budget, 16 * 1024 * 1024), phys * 3 // 4))
    return pltpu.CompilerParams(
        dimension_semantics=dim_sem,
        vmem_limit_bytes=vmem_limit,
    )


# --------------------------------------------------------------------------------------
# Fast path: the whole reduction axis (D) is resident per row-block -> single-pass softmax.
# --------------------------------------------------------------------------------------
def _softmax_full_row_kernel(x_ref, o_ref):
    x = x_ref[...]
    if x.dtype != jnp.float32:
        x = x.astype(jnp.float32)
    m = jnp.max(x, axis=-1, keepdims=True)
    e = jnp.exp(x - m)
    s = jnp.sum(e, axis=-1, keepdims=True)
    # Exact divide: kernel is HBM-bound, the divide is free and keeps row sums at 1.0.
    o_ref[...] = (e / s).astype(o_ref.dtype)


def _softmax_full_row(x: jnp.ndarray, bm: int, budget: int, phys: int) -> jnp.ndarray:
    B, D = x.shape
    itemsize = jnp.dtype(x.dtype).itemsize
    grid = (pl.cdiv(B, bm),)
    return pl.pallas_call(
        _softmax_full_row_kernel,
        out_shape=jax.ShapeDtypeStruct((B, D), x.dtype),
        grid_spec=pltpu.PrefetchScalarGridSpec(
            num_scalar_prefetch=0,
            grid=grid,
            in_specs=[pl.BlockSpec((bm, D), lambda i: (i, 0))],
            out_specs=pl.BlockSpec((bm, D), lambda i: (i, 0)),
        ),
        compiler_params=_compiler_params(("parallel",), budget, phys),
        cost_estimate=pl.CostEstimate(
            flops=5 * B * D,
            transcendentals=B * D,
            bytes_accessed=2 * B * D * itemsize,
        ),
    )(x)


# --------------------------------------------------------------------------------------
# Fallback path for very wide D: two-pass online softmax with the reduction axis tiled.
#   Pass 1: per-row running max / sum-of-exp accumulated directly in the VMEM-resident
#           output blocks; the last step converts them to lse = m + log(l).
#   Pass 2: o = exp(x - lse) per (bm, bd) tile.
# --------------------------------------------------------------------------------------
def _softmax_tiled_d(x: jnp.ndarray, bm: int, bd: int, budget: int, phys: int) -> jnp.ndarray:
    B, D = x.shape
    itemsize = jnp.dtype(x.dtype).itemsize
    nb = pl.cdiv(B, bm)
    nd = pl.cdiv(D, bd)

    def stats_kernel(x_ref, lse_ref, l_ref):
        d = pl.program_id(1)

        @pl.when(d == 0)
        def _():
            lse_ref[...] = jnp.full_like(lse_ref, -jnp.inf)  # running max
            l_ref[...] = jnp.zeros_like(l_ref)               # running sum of exp

        x_blk = x_ref[...].astype(jnp.float32)
        if D % bd != 0:
            # Only emitted when a padded partial D-block actually exists.
            col = d * bd + lax.broadcasted_iota(jnp.int32, x_blk.shape, 1)
            x_blk = jnp.where(col < D, x_blk, -jnp.inf)

        m_prev = lse_ref[...]
        m_new = jnp.maximum(m_prev, jnp.max(x_blk, axis=-1, keepdims=True))
        l_ref[...] = (l_ref[...] * jnp.exp(m_prev - m_new)
                      + jnp.sum(jnp.exp(x_blk - m_new), axis=-1, keepdims=True))
        lse_ref[...] = m_new

        @pl.when(d == pl.num_programs(1) - 1)
        def _():
            lse_ref[...] = lse_ref[...] + jnp.log(l_ref[...])

    lse_rows, _ = pl.pallas_call(
        stats_kernel,
        out_shape=(jax.ShapeDtypeStruct((B, 1), jnp.float32),
                   jax.ShapeDtypeStruct((B, 1), jnp.float32)),
        grid_spec=pltpu.PrefetchScalarGridSpec(
            num_scalar_prefetch=0,
            grid=(nb, nd),
            in_specs=[pl.BlockSpec((bm, bd), lambda i, d: (i, d))],
            out_specs=(pl.BlockSpec((bm, 1), lambda i, d: (i, 0)),
                       pl.BlockSpec((bm, 1), lambda i, d: (i, 0))),
        ),
        compiler_params=_compiler_params(("parallel", "arbitrary"), budget, phys),
        cost_estimate=pl.CostEstimate(
            flops=4 * B * D,
            transcendentals=B * D,
            bytes_accessed=B * D * itemsize,
        ),
    )(x)

    def normalize_kernel(x_ref, lse_ref, o_ref):
        x_blk = x_ref[...]
        if x_blk.dtype != jnp.float32:
            x_blk = x_blk.astype(jnp.float32)
        o_ref[...] = jnp.exp(x_blk - lse_ref[...]).astype(o_ref.dtype)

    return pl.pallas_call(
        normalize_kernel,
        out_shape=jax.ShapeDtypeStruct((B, D), x.dtype),
        grid_spec=pltpu.PrefetchScalarGridSpec(
            num_scalar_prefetch=0,
            grid=(nb, nd),
            in_specs=[pl.BlockSpec((bm, bd), lambda i, d: (i, d)),
                      pl.BlockSpec((bm, 1), lambda i, d: (i, 0))],
            out_specs=pl.BlockSpec((bm, bd), lambda i, d: (i, d)),
        ),
        compiler_params=_compiler_params(("parallel", "parallel"), budget, phys),
        cost_estimate=pl.CostEstimate(
            flops=2 * B * D,
            transcendentals=B * D,
            bytes_accessed=2 * B * D * itemsize,
        ),
    )(x, lse_rows)


# --------------------------------------------------------------------------------------
# Public entry point: softmax along axis=1 of a (B, D) array (matches torch softmax dim=1).
# --------------------------------------------------------------------------------------
def pallas_softmax(x: jnp.ndarray, *, vmem_budget_bytes: int | None = None) -> jnp.ndarray:
    assert x.ndim == 2, "expected (batch, dim) input"
    B, D = x.shape
    itemsize = jnp.dtype(x.dtype).itemsize
    sub = 16 if x.dtype == jnp.bfloat16 else 8  # sublane packing granularity

    phys = _tpu_vmem_bytes()
    budget = _vmem_budget_bytes(phys) if vmem_budget_bytes is None else int(vmem_budget_bytes)

    # Per-element footprint: 2x double-buffered input + 2x double-buffered output
    # (in dtype) plus ~2 f32 words of compiler-materialized temporaries (f32 upcast
    # and exp(x - m)).
    per_elem = 4 * itemsize + 2 * 4
    bytes_per_row = per_elem * D

    if bytes_per_row * sub <= budget:
        # Full-D-resident fast path: largest row block that fits the (honest) budget.
        bm = (budget // bytes_per_row) // sub * sub
        bm = max(sub, min(bm, _round_up(B, sub)))
        # Only split work when a second TensorCore exists (v7x); on 1-TC chips the
        # extra grid step is pure overhead.
        if _num_tensorcores() >= 2 and B >= 2 * sub and pl.cdiv(B, bm) < 2:
            bm = max(sub, _round_up(pl.cdiv(B, 2), sub))
        return _softmax_full_row(x, bm, budget, phys)

    # Very wide rows: tile the reduction dimension (two-pass online softmax).
    bm = max(sub, min(256 // sub * sub, _round_up(B, sub)))
    bd = (budget // (bm * per_elem)) // 128 * 128
    bd = max(128, min(bd, _round_up(D, 128)))
    return _softmax_tiled_d(x, bm, bd, budget, phys)


if __name__ == "__main__":
    key = jax.random.PRNGKey(0)
    # Small shapes consistent with the module's forward: 2D (batch, dim) float32.
    B, D = 8, 512
    x = jax.random.normal(key, (B, D), dtype=jnp.float32)

    out = jax.block_until_ready(pallas_softmax(x))
    ref = jax.nn.softmax(x, axis=1)
    assert out.shape == (B, D)
    assert jnp.allclose(out, ref, rtol=2e-3, atol=1e-6), "softmax mismatch vs reference"
    assert jnp.allclose(jnp.sum(out, axis=1), jnp.ones((B,), jnp.float32), atol=2e-3)

    # Ragged batch (tail row-block padding) exercise.
    B2, D2 = 10, 384
    x2 = jax.random.normal(jax.random.PRNGKey(1), (B2, D2), dtype=jnp.float32)
    out2 = jax.block_until_ready(pallas_softmax(x2))
    assert jnp.allclose(out2, jax.nn.softmax(x2, axis=1), rtol=2e-3, atol=1e-6)

    # Force the wide-D two-pass fallback path with a tiny VMEM budget.
    out3 = jax.block_until_ready(pallas_softmax(x, vmem_budget_bytes=32 * 1024))
    assert jnp.allclose(out3, ref, rtol=2e-3, atol=1e-6), "fallback path mismatch"

    print("KERNEL_OK")
</pallas_src>

<mosaic_0001>
module attributes {stable_mosaic.version = 11 : i64} {
  func.func @_softmax_full_row_kernel(%arg0: i32, %arg1: memref<8x512xf32, #tpu.memory_space<vmem>>, %arg2: memref<8x512xf32, #tpu.memory_space<vmem>>) attributes {dimension_semantics = [#tpu.dimension_semantics<parallel>], iteration_bounds = array<i64: 1>, scalar_prefetch = 0 : i64, scratch_operands = 0 : i64, tpu.core_type = #tpu.core_type<tc>, window_params = [{transform_indices = @transform_0, window_bounds = array<i64: 8, 512>}, {transform_indices = @transform_1, window_bounds = array<i64: 8, 512>}]} {
    %c0 = arith.constant 0 : index
    %c0_0 = arith.constant 0 : index
    %0 = vector.load %arg1[%c0, %c0_0] : memref<8x512xf32, #tpu.memory_space<vmem>>, vector<8x512xf32>
    %cst = arith.constant dense<0xFF800000> : vector<8xf32>
    %1 = vector.multi_reduction <maximumf>, %0, %cst [1] : vector<8x512xf32> to vector<8xf32>
    %2 = vector.shape_cast %1 : vector<8xf32> to vector<8x1xf32>
    %3 = vector.broadcast %2 : vector<8x1xf32> to vector<8x512xf32>
    %4 = arith.subf %0, %3 : vector<8x512xf32>
    %5 = math.exp %4 : vector<8x512xf32>
    %cst_1 = arith.constant dense<0.000000e+00> : vector<8xf32>
    %6 = vector.multi_reduction <add>, %5, %cst_1 [1] : vector<8x512xf32> to vector<8xf32>
    %7 = vector.shape_cast %6 : vector<8xf32> to vector<8x1xf32>
    %8 = vector.broadcast %7 : vector<8x1xf32> to vector<8x512xf32>
    %9 = arith.divf %5, %8 : vector<8x512xf32>
    %c0_2 = arith.constant 0 : index
    %c0_3 = arith.constant 0 : index
    %10 = vector.load %arg2[%c0_2, %c0_3] : memref<8x512xf32, #tpu.memory_space<vmem>>, vector<8x512xf32>
    tpu.vector_store %arg2[%c0_2, %c0_3], %9 {strides = array<i32>} : memref<8x512xf32, #tpu.memory_space<vmem>>, vector<8x512xf32>,
    return
  }
  func.func @transform_0(%arg0: i32) -> (i32, i32) {
    %c0_i32 = arith.constant 0 : i32
    %c0_i32_0 = arith.constant 0 : i32
    return %arg0, %c0_i32 : i32, i32
  }
  func.func @transform_1(%arg0: i32) -> (i32, i32) {
    %c0_i32 = arith.constant 0 : i32
    %c0_i32_0 = arith.constant 0 : i32
    return %arg0, %c0_i32 : i32, i32
  }
}

</mosaic_0001>

<bundles_post_ra>
// kernel: tpu_custom_call.1
= control target key start
LH: loop header
LB: loop body
LE: loop exit
PB: predicated region body
PF: predicated region fallthrough
CT: control target
= control target key end

     0   :  { %6 = vsyncpa [#allocation3], 0  ;;  %s145_s0 = inlined_call_operand.hbm [shape: f32[8,512], index: 0, kind: input, shape index: {}]   ;;  %s146_s1 = inlined_call_operand.hbm [shape: f32[8,512], index: 1, kind: output, shape index: {}]  }
   0x1   :  { %7 = vsyncpa [#allocation4], 0  ;;  %s127_s6 = smov [#allocation2]  }
   0x2   :  { %s14_s7 = sshll.u32 %s127_s6, 4  ;;  %s15_s7 = int_to_ptr.vmem [resolvable:$true] %s14_s7 }
   0x3   :  { %s91_s8 = scalar_lea.vmem %s15_s7, 512  ;;  %p96_p1 = scmp.lt.s32.totalorder %s15_s7, %s15_s7 }
   0x4   :  { %p92_p0 = scmp.ne.s32.totalorder %s15_s7, %s91_s8  ;;  %p97_p2 = scmp.lt.s32.totalorder %s91_s8, %s91_s8 }
   0x6   :  { %p98_p3 = por %p97_p2, %p96_p1 }
   0x8   :  { %p99_p4 = pnand %p98_p3, %p92_p0 }
   0xa   :  { %102 = shalt.err (!%p99_p4)
}
   0xb   :  { %17 = dma.hbm_to_vmem [thread:$0]  %s145_s0, 512, %s15_s7, [#allocation3]  }
   0xc   :  { %123 = dma.done.wait [#allocation3], 512  }
   0xd   :  { %124 = vsyncadd [#allocation3], 4294966784  ;;  %v21_v0 = vld [vmem:[#allocation2] sm:$0xff]  ;;  %v22_v1 = vld [vmem:[#allocation2 + $0x8] sm:$0xff]  ;;  %s128_s0 = smov [#allocation5]  }
   0xe   :  { %v23_v2 = vld [vmem:[#allocation2 + $0x10] sm:$0xff]  ;;  %v24_v3 = vld [vmem:[#allocation2 + $0x18] sm:$0xff]  ;;  %v25_v4 = vmax.f32 %v21_v0, %v22_v1  ;;  %s62_s11 = sshll.u32 %s128_s0, 4  ;;  %s63_s11 = int_to_ptr.vmem [resolvable:$true] %s62_s11 }
   0xf   :  { %v26_v5 = vmax.f32 %v23_v2, %v24_v3  ;;  %s103_s12 = scalar_lea.vmem %s63_s11, 512  ;;  %p108_p6 = scmp.lt.s32.totalorder %s63_s11, %s63_s11 }
  0x10   :  { %p104_p5 = scmp.ne.s32.totalorder %s63_s11, %s103_s12  ;;  %p109_p7 = scmp.lt.s32.totalorder %s103_s12, %s103_s12 }
  0x11   :  { %v27_v6 = vmax.f32 %v25_v4, %v26_v5 }
  0x12   :  { %p110_p8 = por %p109_p7, %p108_p6 }
  0x13   :  { %28 = vmax.xlane.f32.xlu0 %v27_v6 }
  0x14   :  { %p111_p9 = pnand %p110_p8, %p104_p5 }
  0x9c   :  { %v29_v7 = vpop.xlane.xlu0 %28 }
  0x9d   :  { %v30_v8 = vsub.f32 %v21_v0, %v29_v7  ;;  %v31_v9 = vsub.f32 %v22_v1, %v29_v7  ;;  %v32_v10 = vsub.f32 %v23_v2, %v29_v7  ;;  %v33_v11 = vsub.f32 %v24_v3, %v29_v7 }
  0x9f   :  { %v34_v12 = vmul.f32 1.442695, %v30_v8  ;;  %v36_v13 = vmul.f32 1.442695, %v31_v9  ;;  %v38_v14 = vmul.f32 1.442695, %v32_v10 }
  0xa0   :  { %v40_v15 = vmul.f32 1.442695, %v33_v11 }
  0xa1   :  { %73 = vpow2.f32 %v34_v12 }
  0xa2   :  { %75 = vpow2.f32 %v36_v13 }
  0xa3   :  { %77 = vpow2.f32 %v38_v14 }
  0xa4   :  { %79 = vpow2.f32 %v40_v15 }
  0xae   :  { %v74_v16 = vpop.eup %73 }
  0xaf   :  { %v76_v17 = vpop.eup %75 }
  0xb0   :  { %v42_v18 = vadd.f32 %v76_v17, %v74_v16  ;;  %v78_v19 = vpop.eup %77 }
  0xb1   :  { %v80_v21 = vpop.eup %79 }
  0xb2   :  { %v43_v20 = vadd.f32 %v78_v19, %v42_v18 }
  0xb4   :  { %v44_v22 = vadd.f32 %v80_v21, %v43_v20 }
  0xb6   :  { %45 = vadd.xlane.f32.xlu0 %v44_v22 }
 0x13f   :  { %v46_v23 = vpop.xlane.xlu0 %45 }
 0x140   :  { %81 = vrcp.f32 %v46_v23 }
 0x14d   :  { %v82_v24 = vpop.eup %81 }
 0x14e   :  { %v48_v25 = vmul.f32 %v82_v24, %v74_v16  ;;  %v49_v26 = vmul.f32 %v82_v24, %v76_v17  ;;  %v50_v27 = vmul.f32 %v82_v24, %v78_v19  ;;  %v51_v28 = vmul.f32 %v82_v24, %v80_v21 }
 0x150   :  { %52 = vst [vmem:[#allocation5] sm:$0xff] %v48_v25  ;;  %53 = vst [vmem:[#allocation5 + $0x8] sm:$0xff] %v49_v26 }
 0x151   :  { %54 = vst [vmem:[#allocation5 + $0x10] sm:$0xff] %v50_v27  ;;  %55 = vst [vmem:[#allocation5 + $0x18] sm:$0xff] %v51_v28 }
 0x152   :  { %114 = shalt.err (!%p111_p9)
}
 0x153   :  { %65 = dma.vmem_to_hbm [thread:$0]  %s63_s11, 512, %s146_s1, [#allocation4]  }
 0x154   :  { %125 = dma.done.wait [#allocation4], 512  }
 0x155   :  { %126 = vsyncadd [#allocation4], 4294966784 }
 0x156   :  { %69 = vsyncpa [#allocation3], 1 }
 0x157   :  { %70 = vsyncpa [#allocation4], 1 }

</bundles_post_ra>
